<compile_context>
chip_gen: v5e
topology: v5e:2x2
jax: 0.10.0
libtpu: 0.0.40
codegen_flags: <defaults>
</compile_context>

<pallas_src>
import functools

import jax
import jax.numpy as jnp
from jax import lax
from jax.experimental import pallas as pl
from jax.experimental.pallas import tpu as pltpu


def _max_margin_loss_kernel(x_ref, tgt_ref, margin_ref, out_ref,
                            *, s, tile_n, inner, n_valid, mask_rows):
    """One grid step: sum of per-row NLL of (s*x + margin) over one (tile_n, C) block."""
    i = pl.program_id(0)      # batch split (parallel -> one per TensorCore on v7x)
    j = pl.program_id(1)      # reduction steps within the split (arbitrary)

    @pl.when(j == 0)
    def _():
        out_ref[...] = jnp.zeros_like(out_ref)

    # DMA native dtype; cast to f32 per tile (exp/VPU math stays f32 on all chips).
    # margin_ref already holds s * 0.1 * log(m + 1e-7)  ->  logits = s*x + margin.
    logits = s * x_ref[...].astype(jnp.float32) + margin_ref[...]      # (tile_n, C)

    # Numerically stable log-sum-exp over classes.
    mx = jnp.max(logits, axis=-1, keepdims=True)                       # (tile_n, 1)
    lse = mx + jnp.log(jnp.sum(jnp.exp(logits - mx), axis=-1, keepdims=True))

    # Target-class logit via a broadcast (1, C) iota compare + single select.
    cls_ids = lax.broadcasted_iota(jnp.int32, (1, logits.shape[-1]), 1)
    tgt_logit = jnp.sum(jnp.where(cls_ids == tgt_ref[...], logits, 0.0),
                        axis=-1, keepdims=True)

    nll = lse - tgt_logit                                               # (tile_n, 1)

    if mask_rows:  # static: only emitted when the grid over-covers the batch
        row0 = (i * inner + j) * tile_n
        rows = row0 + lax.broadcasted_iota(jnp.int32, (tile_n, 1), 0)
        nll = jnp.where(rows < n_valid, nll, 0.0)  # masked rows may be NaN -> forced 0

    # Per-step scalar reduce accumulated into the resident lane-dense (8,128) slab.
    out_ref[...] += jnp.sum(nll)


def _default_num_splits():
    # v7x has 2 TensorCores/chip; give each its own parallel batch split. v5e/v6e: 1.
    try:
        kind = jax.devices()[0].device_kind.lower()
        if "v7" in kind:
            return 2
    except Exception:
        pass
    return 1


def max_margin_loss(x, target, cls_num_list, *, s=30.0, num_splits=None,
                    target_block_bytes=6 << 20):
    """x: (N, C) logits; target: (N,) int; cls_num_list: (C,) class counts."""
    # TODO(synk): per-class `weight` (None in this module's default) is not implemented.
    N, C = x.shape
    if num_splits is None:
        num_splits = _default_num_splits()

    # Grid-invariant scaled margin, precomputed once (tiny (1, C) array).
    m_list = jnp.asarray(cls_num_list, dtype=jnp.float32).reshape(1, C)
    margin = (float(s) * 0.1) * jnp.log(m_list + 1e-7)

    # Batch tile sized for ~target_block_bytes of f32 working set per grid step.
    # Blocks span the full class dim (softmax needs it anyway) so there is no class
    # padding and no wrapper-side astype/pad pass over the (N, C) tensor.
    tile_target = max(8, (int(target_block_bytes) // (C * 4)) // 8 * 8)
    if N % 8 == 0:
        tile_n = min(tile_target, N)
    elif N < 8:
        tile_n = N                                # full-dim block
    else:
        tile_n = min(tile_target, (N // 8) * 8)   # multiple of 8; last block partial

    num_blocks = -(-N // tile_n)
    num_splits = max(1, min(int(num_splits), num_blocks))
    inner = -(-num_blocks // num_splits)

    # Ragged coverage handled by the in-kernel row mask (no batch padding in HBM).
    mask_rows = (num_splits * inner * tile_n != N)

    if num_splits * inner > num_blocks:
        # Trailing blocks of the last split are fully out of range: clamp the DMA to
        # the last valid block; the row mask zeroes their contribution.
        def blk_map(i, j):
            return (jnp.minimum(i * inner + j, num_blocks - 1), 0)
    else:
        def blk_map(i, j):
            return (i * inner + j, 0)

    tgt2d = target.astype(jnp.int32).reshape(N, 1)

    kernel = functools.partial(
        _max_margin_loss_kernel, s=float(s), tile_n=tile_n, inner=inner,
        n_valid=N, mask_rows=mask_rows)

    # VMEM: double-buffered native-dtype x block + ~3 full-tile f32 temporaries.
    # Capping at 48 MiB keeps headroom on v7x's 64 MiB physical VMEM.
    blk_native = tile_n * C * x.dtype.itemsize
    blk_f32 = tile_n * C * 4
    vmem_est = 2 * blk_native + 3 * blk_f32 + (2 << 20)
    vmem_limit = int(min(48 << 20, max(32 << 20, vmem_est)))

    cost = pl.CostEstimate(
        flops=6 * N * C,
        transcendentals=N * C + N,
        bytes_accessed=N * C * x.dtype.itemsize + N * 4 + C * 4
                       + num_splits * 8 * 128 * 4)

    out = pl.pallas_call(
        kernel,
        out_shape=jax.ShapeDtypeStruct((num_splits * 8, 128), jnp.float32),
        grid_spec=pltpu.PrefetchScalarGridSpec(
            num_scalar_prefetch=0,
            grid=(num_splits, inner),
            in_specs=[
                pl.BlockSpec((tile_n, C), blk_map),            # x (native dtype)
                pl.BlockSpec((tile_n, 1), blk_map),            # target
                pl.BlockSpec((1, C), lambda i, j: (0, 0)),     # precomputed margin
            ],
            out_specs=pl.BlockSpec((8, 128), lambda i, j: (i, 0)),  # per-split slab
        ),
        compiler_params=pltpu.CompilerParams(
            # "parallel" on the split axis lets v7x's 2 TCs each own a split, each
            # accumulating into its own lane-dense (8,128) slab.
            dimension_semantics=("parallel", "arbitrary"),
            vmem_limit_bytes=vmem_limit,
        ),
        cost_estimate=cost,
    )(x, tgt2d, margin)

    # Each split's (8,128) slab is filled uniformly with its partial NLL sum.
    partials = out.reshape(num_splits, 8, 128)[:, 0, 0]
    return jnp.sum(partials) / jnp.float32(N)


def _reference(x, target, cls_num_list, s=30.0):
    """Pure-JAX reference matching F.cross_entropy(s*(x+0.1*log(m+1e-7)), target)."""
    m = jnp.asarray(cls_num_list, jnp.float32)
    logits = s * (x + 0.1 * jnp.log(m + 1e-7))
    logp = jax.nn.log_softmax(logits, axis=-1)
    nll = -jnp.take_along_axis(logp, target[:, None].astype(jnp.int32), axis=-1)[:, 0]
    return jnp.mean(nll)


if __name__ == "__main__":
    key = jax.random.PRNGKey(0)
    N, C = 16, 32  # batch, num classes

    kx, kt, kc = jax.random.split(key, 3)
    x = jax.random.normal(kx, (N, C), dtype=jnp.float32)
    target = jax.random.randint(kt, (N,), 0, C, dtype=jnp.int32)
    # deterministic synthetic class-count list (what __init__ receives)
    cls_num_list = jax.random.randint(kc, (C,), 1, 1000, dtype=jnp.int32).astype(jnp.float32)

    loss = max_margin_loss(x, target, cls_num_list, s=30.0)
    loss = jax.block_until_ready(loss)

    ref = _reference(x, target, cls_num_list, s=30.0)
    assert jnp.allclose(loss, ref, rtol=1e-5, atol=1e-5), (loss, ref)
    print("KERNEL_OK")
</pallas_src>

<mosaic_0001>
module attributes {stable_mosaic.version = 11 : i64} {
  func.func @_max_margin_loss_kernel(%arg0: i32, %arg1: i32, %arg2: memref<16x32xf32, #tpu.memory_space<vmem>>, %arg3: memref<16x1xi32, #tpu.memory_space<vmem>>, %arg4: memref<1x32xf32, #tpu.memory_space<vmem>>, %arg5: memref<8x128xf32, #tpu.memory_space<vmem>>) attributes {dimension_semantics = [#tpu.dimension_semantics<parallel>, #tpu.dimension_semantics<arbitrary>], iteration_bounds = array<i64: 1, 1>, scalar_prefetch = 0 : i64, scratch_operands = 0 : i64, tpu.core_type = #tpu.core_type<tc>, window_params = [{transform_indices = @transform_0, window_bounds = array<i64: 16, 32>}, {transform_indices = @transform_1, window_bounds = array<i64: 16, 1>}, {pipeline_mode = #tpu.pipeline_mode<synchronous>, transform_indices = @transform_2, window_bounds = array<i64: 1, 32>}, {transform_indices = @transform_3, window_bounds = array<i64: 8, 128>}]} {
    %c0_i32 = arith.constant 0 : i32
    %0 = arith.cmpi eq, %arg1, %c0_i32 : i32
    %1 = arith.extui %0 : i1 to i32
    %c0_i32_0 = arith.constant 0 : i32
    %2 = arith.cmpi ne, %1, %c0_i32_0 : i32
    scf.if %2 {
      %cst_15 = arith.constant 0.000000e+00 : f32
      %36 = vector.broadcast %cst_15 : f32 to vector<8x128xf32>
      %c0_16 = arith.constant 0 : index
      %c0_17 = arith.constant 0 : index
      %37 = vector.load %arg5[%c0_16, %c0_17] : memref<8x128xf32, #tpu.memory_space<vmem>>, vector<8x128xf32>
      tpu.vector_store %arg5[%c0_16, %c0_17], %36 {strides = array<i32>} : memref<8x128xf32, #tpu.memory_space<vmem>>, vector<8x128xf32>,
    } else {
    }
    %c0 = arith.constant 0 : index
    %c0_1 = arith.constant 0 : index
    %3 = vector.load %arg2[%c0, %c0_1] : memref<16x32xf32, #tpu.memory_space<vmem>>, vector<16x32xf32>
    %cst = arith.constant 3.000000e+01 : f32
    %4 = vector.broadcast %cst : f32 to vector<16x32xf32>
    %5 = arith.mulf %4, %3 : vector<16x32xf32>
    %c0_2 = arith.constant 0 : index
    %c0_3 = arith.constant 0 : index
    %6 = vector.load %arg4[%c0_2, %c0_3] : memref<1x32xf32, #tpu.memory_space<vmem>>, vector<1x32xf32>
    %7 = vector.broadcast %6 : vector<1x32xf32> to vector<16x32xf32>
    %8 = arith.addf %5, %7 : vector<16x32xf32>
    %cst_4 = arith.constant dense<0xFF800000> : vector<16xf32>
    %9 = vector.multi_reduction <maximumf>, %8, %cst_4 [1] : vector<16x32xf32> to vector<16xf32>
    %10 = vector.shape_cast %9 : vector<16xf32> to vector<16x1xf32>
    %11 = vector.broadcast %10 : vector<16x1xf32> to vector<16x32xf32>
    %12 = arith.subf %8, %11 : vector<16x32xf32>
    %13 = math.exp %12 : vector<16x32xf32>
    %cst_5 = arith.constant dense<0.000000e+00> : vector<16xf32>
    %14 = vector.multi_reduction <add>, %13, %cst_5 [1] : vector<16x32xf32> to vector<16xf32>
    %15 = vector.shape_cast %14 : vector<16xf32> to vector<16x1xf32>
    %16 = math.log %15 : vector<16x1xf32>
    %17 = arith.addf %10, %16 : vector<16x1xf32>
    %18 = tpu.iota {dimensions = array<i32: 1>} : vector<1x32xi32>
    %c0_6 = arith.constant 0 : index
    %c0_7 = arith.constant 0 : index
    %19 = vector.load %arg3[%c0_6, %c0_7] : memref<16x1xi32, #tpu.memory_space<vmem>>, vector<16x1xi32>
    %20 = vector.broadcast %18 : vector<1x32xi32> to vector<16x32xi32>
    %21 = vector.broadcast %19 : vector<16x1xi32> to vector<16x32xi32>
    %22 = arith.cmpi eq, %20, %21 : vector<16x32xi32>
    %cst_8 = arith.constant 0.000000e+00 : f32
    %23 = vector.broadcast %cst_8 : f32 to vector<16x32xf32>
    %24 = arith.select %22, %8, %23 : vector<16x32xi1>, vector<16x32xf32>
    %cst_9 = arith.constant dense<0.000000e+00> : vector<16xf32>
    %25 = vector.multi_reduction <add>, %24, %cst_9 [1] : vector<16x32xf32> to vector<16xf32>
    %26 = vector.shape_cast %25 : vector<16xf32> to vector<16x1xf32>
    %27 = arith.subf %17, %26 : vector<16x1xf32>
    %c0_10 = arith.constant 0 : index
    %c0_11 = arith.constant 0 : index
    %28 = vector.load %arg5[%c0_10, %c0_11] : memref<8x128xf32, #tpu.memory_space<vmem>>, vector<8x128xf32>
    %29 = vector.shape_cast %27 : vector<16x1xf32> to vector<1x16x1xf32>
    %cst_12 = arith.constant dense<0.000000e+00> : vector<1xf32>
    %30 = vector.multi_reduction <add>, %29, %cst_12 [1, 2] : vector<1x16x1xf32> to vector<1xf32>
    %31 = vector.shape_cast %30 : vector<1xf32> to vector<1x1x1xf32>
    %32 = vector.extract %31[0, 0, 0] : f32 from vector<1x1x1xf32>
    %33 = vector.broadcast %32 : f32 to vector<8x128xf32>
    %34 = arith.addf %28, %33 : vector<8x128xf32>
    %c0_13 = arith.constant 0 : index
    %c0_14 = arith.constant 0 : index
    %35 = vector.load %arg5[%c0_13, %c0_14] : memref<8x128xf32, #tpu.memory_space<vmem>>, vector<8x128xf32>
    tpu.vector_store %arg5[%c0_13, %c0_14], %34 {strides = array<i32>} : memref<8x128xf32, #tpu.memory_space<vmem>>, vector<8x128xf32>,
    return
  }
  func.func @transform_0(%arg0: i32, %arg1: i32) -> (i32, i32) {
    %c1_i32 = arith.constant 1 : i32
    %0 = arith.muli %arg0, %c1_i32 : i32
    %1 = arith.addi %0, %arg1 : i32
    %c0_i32 = arith.constant 0 : i32
    %c0_i32_0 = arith.constant 0 : i32
    return %1, %c0_i32 : i32, i32
  }
  func.func @transform_1(%arg0: i32, %arg1: i32) -> (i32, i32) {
    %c1_i32 = arith.constant 1 : i32
    %0 = arith.muli %arg0, %c1_i32 : i32
    %1 = arith.addi %0, %arg1 : i32
    %c0_i32 = arith.constant 0 : i32
    %c0_i32_0 = arith.constant 0 : i32
    return %1, %c0_i32 : i32, i32
  }
  func.func @transform_2(%arg0: i32, %arg1: i32) -> (i32, i32) {
    %c0_i32 = arith.constant 0 : i32
    %c0_i32_0 = arith.constant 0 : i32
    %c0_i32_1 = arith.constant 0 : i32
    return %c0_i32, %c0_i32_0 : i32, i32
  }
  func.func @transform_3(%arg0: i32, %arg1: i32) -> (i32, i32) {
    %c0_i32 = arith.constant 0 : i32
    %c0_i32_0 = arith.constant 0 : i32
    return %arg0, %c0_i32 : i32, i32
  }
}

</mosaic_0001>

<bundles_post_ra>
// kernel: tpu_custom_call.1
= control target key start
LH: loop header
LB: loop body
LE: loop exit
PB: predicated region body
PF: predicated region fallthrough
CT: control target
= control target key end

     0   :  { %vm74_vm0 = vcmask 261120   ;;  %v208_v5 = vmov 0   ;;  %s254_s0 = inlined_call_operand.vmem [shape: f32[16,32], index: 0, kind: input, shape index: {}]   ;;  %s255_s1 = inlined_call_operand.vmem [shape: s32[16,1], index: 1, kind: input, shape index: {}]   ;;  %s256_s2 = inlined_call_operand.vmem [shape: f32[1,32], index: 2, kind: input, shape index: {}]   ;;  %s257_s3 = inlined_call_operand.hbm [shape: f32[8,128], index: 3, kind: output, shape index: {}]  }
   0x1   :  { %v64_v0 = vld [vmem:[%s254_s0] sm:$0xff]  ;;  %v65_v3 = vld [vmem:[%s254_s0 + $0x8] sm:$0xff]  ;;  %171 = vset.pattern.permute.xlu1 %v208_v5  ;;  %172 = vset.pattern.permute.xlu0 %v208_v5 }
   0x2   :  { %v173_v1 = vld [vmem:[%s256_s2] ss:$0 sm:$0xff]  ;;  %v66_v2 = vmul.f32 30.0, %v64_v0 }
   0x3   :  { %v101_v4 = vld [vmem:[%s255_s1] sm:$0xff] }
   0x4   :  { %8 = vsyncpa [#allocation3], 0  ;;  %v72_v6 = vadd.f32 %v173_v1, %v66_v2  ;;  %v67_v7 = vmul.f32 30.0, %v65_v3  ;;  %104 = vperm.xlu1 %171, %v101_v4   ;;  %v102_v10 = vld [vmem:[%s255_s1 + $0x8] sm:$0xff]  ;;  %v99_v12 = vlaneseq  ;;  %vm122_vm3 = vcmask 7168   ;;  %s209_s0 = smov [#allocation2]  }
   0x5   :  { %s143_s1 = sshll.u32 %s209_s0, 4  ;;  %s145_s23 = sshll.u32 %s257_s3, 4  ;;  %s144_s1 = int_to_ptr.vmem [resolvable:$true] %s143_s1  ;;  %s146_s23 = int_to_ptr.hbm [resolvable:$true] %s145_s23 }
   0x6   :  { %v75_v8 = vsel %vm74_vm0, %v72_v6, -inf  ;;  %v73_v9 = vadd.f32 %v173_v1, %v67_v7  ;;  %v100_v13 = vand.u32 127, %v99_v12 }
   0x7   :  { %76 = vmax.xlane.f32.xlu0 %v75_v8 }
   0x8   :  { %v78_v11 = vsel %vm74_vm0, %v73_v9, -inf }
   0xc   :  { %107 = vperm.xlu1 %171, %v102_v10  }
   0xf   :  { %79 = vmax.xlane.f32.xlu0 %v78_v11 }
  0x76   :  { %v105_v14 = vpop.permute.xlu1 %104 }
  0x77   :  { %vm109_vm1 = vcmp.eq.s32.totalorder %v100_v13, %v105_v14 }
  0x78   :  { %v111_v15 = vsel %vm109_vm1, %v72_v6, 0.0 }
  0x79   :  { %v113_v16 = vsel %vm74_vm0, %v111_v15, 0.0 }
  0x7a   :  { %v77_v17 = vpop.xlane.xlu0 %76  ;;  %114 = vadd.xlane.f32.xlu0 %v113_v16 }
  0x7b   :  { %v81_v18 = vsub.f32 %v72_v6, %v77_v17 }
  0x7d   :  { %v83_v19 = vmul.f32 1.442695, %v81_v18 }
  0x7e   :  { %v108_v20 = vpop.permute.xlu1 %107 }
  0x7f   :  { %174 = vpow2.f32 %v83_v19  ;;  %vm110_vm2 = vcmp.eq.s32.totalorder %v100_v13, %v108_v20 }
  0x80   :  { %v112_v21 = vsel %vm110_vm2, %v73_v9, 0.0 }
  0x81   :  { %v116_v22 = vsel %vm74_vm0, %v112_v21, 0.0 }
  0x82   :  { %v80_v23 = vpop.xlane.xlu0 %79  ;;  %117 = vadd.xlane.f32.xlu1 %v116_v22 }
  0x83   :  { %v82_v24 = vsub.f32 %v73_v9, %v80_v23 }
  0x85   :  { %v175_v25 = vpop.eup %174  ;;  %v85_v26 = vmul.f32 1.442695, %v82_v24 }
  0x86   :  { %v87_v27 = vsel %vm74_vm0, %v175_v25, 0.0 }
  0x87   :  { %176 = vpow2.f32 %v85_v26  ;;  %88 = vadd.xlane.f32.xlu2 %v87_v27 }
  0x8d   :  { %v177_v28 = vpop.eup %176 }
  0x8e   :  { %v90_v29 = vsel %vm74_vm0, %v177_v28, 0.0 }
  0x8f   :  { %91 = vadd.xlane.f32.xlu2 %v90_v29 }
  0xed   :  { %v115_v36 = vpop.xlane.xlu0 %114 }
  0xf5   :  { %v118_v40 = vpop.xlane.xlu1 %117 }
  0xfa   :  { %v89_v30 = vpop.xlane.xlu2 %88 }
  0xfb   :  { %178 = vlog2.f32 %v89_v30 }
 0x101   :  { %v179_v31 = vpop.eup %178 }
 0x102   :  { %v92_v32 = vpop.xlane.xlu2 %91  ;;  %v94_v33 = vmul.f32 0.6931472, %v179_v31 }
 0x103   :  { %180 = vlog2.f32 %v92_v32 }
 0x104   :  { %v97_v34 = vadd.f32 %v94_v33, %v77_v17 }
 0x106   :  { %v119_v39 = vsub.f32 %v97_v34, %v115_v36 }
 0x108   :  { %v123_v42 = vsel %vm122_vm3, %v119_v39, 0.0 }
 0x109   :  { %v181_v35 = vpop.eup %180 }
 0x10a   :  { %v96_v37 = vmul.f32 0.6931472, %v181_v35 }
 0x10c   :  { %v98_v38 = vadd.f32 %v96_v37, %v80_v23 }
 0x10e   :  { %v120_v41 = vsub.f32 %v98_v38, %v118_v40 }
 0x110   :  { %v124_v43 = vsel %vm122_vm3, %v120_v41, 0.0 }
 0x111   :  { %v125_v44 = vadd.f32 %v124_v43, %v123_v42 }
 0x113   :  { %126 = vadd.xlane.f32.xlu2 %v125_v44 }
 0x186   :  { %v127_v45 = vpop.xlane.xlu2 %126 }
 0x187   :  { %v128_v46 = vrot.slane %v127_v45, 4 }
 0x189   :  { %v129_v47 = vadd.f32 %v128_v46, %v127_v45 }
 0x18b   :  { %v130_v48 = vrot.slane %v129_v47, 2 }
 0x18d   :  { %v131_v49 = vadd.f32 %v130_v48, %v129_v47 }
 0x18f   :  { %v132_v50 = vrot.slane %v131_v49, 1 }
 0x191   :  { %v133_v51 = vadd.f32 %v132_v50, %v131_v49 }
 0x193   :  { %166 = vpush %v133_v51 }
 0x1c4   :  { %s167_s24 = spop %166 }
 0x1c5   :  { %v135_v52 = vstv %s167_s24 }
 0x1c6   :  { %137 = vst [vmem:[#allocation2] sm:$0xff] %v135_v52 }
 0x1c7   :  { %148 = dma.vmem_to_hbm [thread:$0]  %s144_s1, 128, %s146_s23, [#allocation3]  }
 0x1c8   :  { %206 = dma.done.wait [#allocation3], 128  }
 0x1c9   :  { %207 = vsyncadd [#allocation3], 4294967168 }
 0x1ca   :  { %153 = vsyncpa [#allocation3], 1 }

</bundles_post_ra>
